<compile_context>
chip_gen: v5e
topology: v5e:2x2
jax: 0.10.0
libtpu: 0.0.40
codegen_flags: <defaults>
</compile_context>

<pallas_src>
import functools

import jax
import jax.numpy as jnp
from jax import lax
from jax.experimental import pallas as pl
from jax.experimental.pallas import tpu as pltpu


def _conv3x3_sigmoid_kernel(x_ref, w_ref, b_ref, o_ref, patches_ref, *, H, W):
    # x_ref:       (Cin, H*W + 2*W + 2)  zero-guarded flat image (row-major).
    # w_ref:       (Cout, 9*Cin)         tap-major / channel-minor weights.
    # b_ref:       (Cout, 1)             bias.
    # o_ref:       (Cout, H*W)           lane-dense output.
    # patches_ref: (9*Cin, H*W)          VMEM im2col scratch.
    Cin = x_ref.shape[0]
    HW = H * W

    # Output-pixel column index per lane; masks for taps that reach across the
    # left/right image border (those lanes must see the conv's zero padding,
    # not the neighbouring row's pixel). Built exactly once (hoisted).
    col = lax.broadcasted_iota(jnp.int32, (Cin, HW), 1) % W
    keep_left = col != 0            # needed by kx == 0 taps
    keep_right = col != (W - 1)     # needed by kx == 2 taps
    zero = jnp.zeros((), dtype=x_ref.dtype)

    # im2col: 9 lane-shifted copies of the flat image, stacked along K.
    for ky in range(3):
        for kx in range(3):
            s = ky * W + kx                       # static lane offset of this tap
            t = x_ref[:, s:s + HW]                # (Cin, HW) lane-offset slice
            if kx == 0:
                t = jnp.where(keep_left, t, zero)
            elif kx == 2:
                t = jnp.where(keep_right, t, zero)
            tap = ky * 3 + kx
            patches_ref[tap * Cin:(tap + 1) * Cin, :] = t

    # Single K = 9*Cin matmul on the MXU (native input dtype, f32 accumulate).
    acc = jnp.dot(w_ref[...], patches_ref[...],
                  preferred_element_type=jnp.float32)        # (Cout, HW)
    acc = acc + b_ref[...].astype(jnp.float32)               # lane broadcast
    o_ref[...] = jax.nn.sigmoid(acc).astype(o_ref.dtype)     # EUP, f32


def feature_attention(x_nchw, weight, bias):
    """sigmoid(conv2d(x, weight, bias, stride=1, padding=1)).

    x_nchw: (N, Cin, H, W); weight: (3, 3, Cin, Cout); bias: (Cout,).
    Returns (N, Cout, H, W).
    """
    N, Cin, H, W = x_nchw.shape
    Cout = weight.shape[-1]
    HW = H * W
    flat_len = HW + 2 * W + 2

    # Single pad on the flattened image: (W+1) zeros each side == top zero row
    # + bottom zero row + one guard lane at each end.
    x_flat = jnp.pad(x_nchw.reshape(N, Cin, HW),
                     ((0, 0), (0, 0), (W + 1, W + 1)))        # (N, Cin, flat_len)

    # Weight as (Cout, 9*Cin): w_mat[co, (ky*3+kx)*Cin + ci] = weight[ky,kx,ci,co]
    w_mat = jnp.transpose(weight, (3, 0, 1, 2)).reshape(Cout, 9 * Cin)
    b_2d = bias.reshape(Cout, 1)

    kernel = functools.partial(_conv3x3_sigmoid_kernel, H=H, W=W)

    out_flat = pl.pallas_call(
        kernel,
        out_shape=jax.ShapeDtypeStruct((N, Cout, HW), x_nchw.dtype),
        grid=(N,),
        in_specs=[
            pl.BlockSpec((None, Cin, flat_len), lambda n: (n, 0, 0)),
            pl.BlockSpec((Cout, 9 * Cin), lambda n: (0, 0)),
            pl.BlockSpec((Cout, 1), lambda n: (0, 0)),
        ],
        out_specs=pl.BlockSpec((None, Cout, HW), lambda n: (n, 0, 0)),
        scratch_shapes=[pltpu.VMEM((9 * Cin, HW), x_nchw.dtype)],
        compiler_params=pltpu.CompilerParams(
            dimension_semantics=("parallel",),
        ),
    )(x_flat, w_mat, b_2d)

    # (N, Cout, H*W) -> NCHW is a free reshape (no transpose needed).
    return out_flat.reshape(N, Cout, H, W)


def reference(x_nchw, weight, bias):
    # Pure-JAX reference: conv2d (NCHW, OIHW) + sigmoid, same as PyTorch.
    w_oihw = jnp.transpose(weight, (3, 2, 0, 1))  # (Cout, Cin, 3, 3)
    y = lax.conv_general_dilated(
        x_nchw, w_oihw, window_strides=(1, 1), padding=((1, 1), (1, 1)),
        dimension_numbers=("NCHW", "OIHW", "NCHW"),
    )
    y = y + bias.reshape(1, -1, 1, 1)
    return jax.nn.sigmoid(y)


if __name__ == "__main__":
    key = jax.random.PRNGKey(0)
    k_x, k_w, k_b = jax.random.split(key, 3)

    N, Cin, Cout, H, W = 2, 4, 8, 16, 16
    x = jax.random.normal(k_x, (N, Cin, H, W), dtype=jnp.float32)
    # Deterministic parameter init (matches nn.Conv2d shapes: (Cout,Cin,3,3),(Cout,))
    weight = 0.1 * jax.random.normal(k_w, (3, 3, Cin, Cout), dtype=jnp.float32)
    bias = 0.1 * jax.random.normal(k_b, (Cout,), dtype=jnp.float32)

    out = jax.block_until_ready(feature_attention(x, weight, bias))
    ref = jax.block_until_ready(reference(x, weight, bias))

    assert out.shape == (N, Cout, H, W)
    err = jnp.max(jnp.abs(out - ref))
    assert jnp.allclose(out, ref, atol=1e-5, rtol=1e-5), f"max abs err {err}"
    print("KERNEL_OK")
</pallas_src>

<mosaic_0001>
module attributes {stable_mosaic.version = 11 : i64} {
  func.func @_conv3x3_sigmoid_kernel(%arg0: i32, %arg1: memref<1x4x290xf32, #tpu.memory_space<vmem>>, %arg2: memref<8x36xf32, #tpu.memory_space<vmem>>, %arg3: memref<8x1xf32, #tpu.memory_space<vmem>>, %arg4: memref<1x8x256xf32, #tpu.memory_space<vmem>>, %arg5: memref<36x256xf32, #tpu.memory_space<vmem>>) attributes {dimension_semantics = [#tpu.dimension_semantics<parallel>], iteration_bounds = array<i64: 2>, scalar_prefetch = 0 : i64, scratch_operands = 1 : i64, tpu.core_type = #tpu.core_type<tc>, window_params = [{transform_indices = @transform_0, window_bounds = array<i64: 1, 4, 290>}, {pipeline_mode = #tpu.pipeline_mode<synchronous>, transform_indices = @transform_1, window_bounds = array<i64: 8, 36>}, {pipeline_mode = #tpu.pipeline_mode<synchronous>, transform_indices = @transform_2, window_bounds = array<i64: 8, 1>}, {transform_indices = @transform_3, window_bounds = array<i64: 1, 8, 256>}]} {
    %0 = tpu.iota {dimensions = array<i32: 1>} : vector<4x256xi32>
    %c16_i32 = arith.constant 16 : i32
    %c0_i32 = arith.constant 0 : i32
    %1 = arith.cmpi eq, %c16_i32, %c0_i32 : i32
    %c1_i32 = arith.constant 1 : i32
    %2 = arith.select %1, %c1_i32, %c16_i32 : i32
    %3 = vector.broadcast %2 : i32 to vector<4x256xi32>
    %4 = arith.remsi %0, %3 : vector<4x256xi32>
    %c0_i32_0 = arith.constant 0 : i32
    %5 = vector.broadcast %c0_i32_0 : i32 to vector<4x256xi32>
    %6 = arith.cmpi ne, %4, %5 : vector<4x256xi32>
    %c0_i32_1 = arith.constant 0 : i32
    %7 = vector.broadcast %c0_i32_1 : i32 to vector<4x256xi32>
    %8 = arith.cmpi slt, %4, %7 : vector<4x256xi32>
    %c0_i32_2 = arith.constant 0 : i32
    %9 = arith.cmpi slt, %2, %c0_i32_2 : i32
    %10 = vector.broadcast %9 : i1 to vector<4x256xi1>
    %11 = vector.broadcast %10 : vector<4x256xi1> to vector<4x256xi1>
    %12 = arith.xori %8, %11 : vector<4x256xi1>
    %13 = arith.andi %12, %6 : vector<4x256xi1>
    %14 = vector.broadcast %2 : i32 to vector<4x256xi32>
    %15 = arith.addi %4, %14 : vector<4x256xi32>
    %16 = arith.select %13, %15, %4 : vector<4x256xi1>, vector<4x256xi32>
    %c0_i32_3 = arith.constant 0 : i32
    %17 = vector.broadcast %c0_i32_3 : i32 to vector<4x256xi32>
    %18 = arith.cmpi ne, %16, %17 : vector<4x256xi32>
    %c15_i32 = arith.constant 15 : i32
    %19 = vector.broadcast %c15_i32 : i32 to vector<4x256xi32>
    %20 = arith.cmpi ne, %16, %19 : vector<4x256xi32>
    %c0 = arith.constant 0 : index
    %c0_4 = arith.constant 0 : index
    %c0_5 = arith.constant 0 : index
    %21 = vector.load %arg1[%c0, %c0_4, %c0_5] : memref<1x4x290xf32, #tpu.memory_space<vmem>>, vector<1x4x256xf32>
    %22 = vector.shape_cast %21 : vector<1x4x256xf32> to vector<4x256xf32>
    %cst = arith.constant 0.000000e+00 : f32
    %23 = vector.broadcast %cst : f32 to vector<4x256xf32>
    %24 = arith.select %18, %22, %23 : vector<4x256xi1>, vector<4x256xf32>
    %c0_6 = arith.constant 0 : index
    %c0_7 = arith.constant 0 : index
    %25 = vector.load %arg5[%c0_6, %c0_7] : memref<36x256xf32, #tpu.memory_space<vmem>>, vector<4x256xf32>
    tpu.vector_store %arg5[%c0_6, %c0_7], %24 {strides = array<i32>} : memref<36x256xf32, #tpu.memory_space<vmem>>, vector<4x256xf32>,
    %c0_8 = arith.constant 0 : index
    %c0_9 = arith.constant 0 : index
    %c1 = arith.constant 1 : index
    %26 = vector.load %arg1[%c0_8, %c0_9, %c1] : memref<1x4x290xf32, #tpu.memory_space<vmem>>, vector<1x4x256xf32>
    %27 = vector.shape_cast %26 : vector<1x4x256xf32> to vector<4x256xf32>
    %c4 = arith.constant 4 : index
    %c0_10 = arith.constant 0 : index
    %28 = vector.load %arg5[%c4, %c0_10] : memref<36x256xf32, #tpu.memory_space<vmem>>, vector<4x256xf32>
    tpu.vector_store %arg5[%c4, %c0_10], %27 {strides = array<i32>} : memref<36x256xf32, #tpu.memory_space<vmem>>, vector<4x256xf32>,
    %c0_11 = arith.constant 0 : index
    %c0_12 = arith.constant 0 : index
    %c2 = arith.constant 2 : index
    %29 = vector.load %arg1[%c0_11, %c0_12, %c2] : memref<1x4x290xf32, #tpu.memory_space<vmem>>, vector<1x4x256xf32>
    %30 = vector.shape_cast %29 : vector<1x4x256xf32> to vector<4x256xf32>
    %cst_13 = arith.constant 0.000000e+00 : f32
    %31 = vector.broadcast %cst_13 : f32 to vector<4x256xf32>
    %32 = arith.select %20, %30, %31 : vector<4x256xi1>, vector<4x256xf32>
    %c8 = arith.constant 8 : index
    %c0_14 = arith.constant 0 : index
    %33 = vector.load %arg5[%c8, %c0_14] : memref<36x256xf32, #tpu.memory_space<vmem>>, vector<4x256xf32>
    tpu.vector_store %arg5[%c8, %c0_14], %32 {strides = array<i32>} : memref<36x256xf32, #tpu.memory_space<vmem>>, vector<4x256xf32>,
    %c0_15 = arith.constant 0 : index
    %c0_16 = arith.constant 0 : index
    %c16 = arith.constant 16 : index
    %34 = vector.load %arg1[%c0_15, %c0_16, %c16] : memref<1x4x290xf32, #tpu.memory_space<vmem>>, vector<1x4x256xf32>
    %35 = vector.shape_cast %34 : vector<1x4x256xf32> to vector<4x256xf32>
    %cst_17 = arith.constant 0.000000e+00 : f32
    %36 = vector.broadcast %cst_17 : f32 to vector<4x256xf32>
    %37 = arith.select %18, %35, %36 : vector<4x256xi1>, vector<4x256xf32>
    %c12 = arith.constant 12 : index
    %c0_18 = arith.constant 0 : index
    %38 = vector.load %arg5[%c12, %c0_18] : memref<36x256xf32, #tpu.memory_space<vmem>>, vector<4x256xf32>
    tpu.vector_store %arg5[%c12, %c0_18], %37 {strides = array<i32>} : memref<36x256xf32, #tpu.memory_space<vmem>>, vector<4x256xf32>,
    %c0_19 = arith.constant 0 : index
    %c0_20 = arith.constant 0 : index
    %c17 = arith.constant 17 : index
    %39 = vector.load %arg1[%c0_19, %c0_20, %c17] : memref<1x4x290xf32, #tpu.memory_space<vmem>>, vector<1x4x256xf32>
    %40 = vector.shape_cast %39 : vector<1x4x256xf32> to vector<4x256xf32>
    %c16_21 = arith.constant 16 : index
    %c0_22 = arith.constant 0 : index
    %41 = vector.load %arg5[%c16_21, %c0_22] : memref<36x256xf32, #tpu.memory_space<vmem>>, vector<4x256xf32>
    tpu.vector_store %arg5[%c16_21, %c0_22], %40 {strides = array<i32>} : memref<36x256xf32, #tpu.memory_space<vmem>>, vector<4x256xf32>,
    %c0_23 = arith.constant 0 : index
    %c0_24 = arith.constant 0 : index
    %c18 = arith.constant 18 : index
    %42 = vector.load %arg1[%c0_23, %c0_24, %c18] : memref<1x4x290xf32, #tpu.memory_space<vmem>>, vector<1x4x256xf32>
    %43 = vector.shape_cast %42 : vector<1x4x256xf32> to vector<4x256xf32>
    %cst_25 = arith.constant 0.000000e+00 : f32
    %44 = vector.broadcast %cst_25 : f32 to vector<4x256xf32>
    %45 = arith.select %20, %43, %44 : vector<4x256xi1>, vector<4x256xf32>
    %c20 = arith.constant 20 : index
    %c0_26 = arith.constant 0 : index
    %46 = vector.load %arg5[%c20, %c0_26] : memref<36x256xf32, #tpu.memory_space<vmem>>, vector<4x256xf32>
    tpu.vector_store %arg5[%c20, %c0_26], %45 {strides = array<i32>} : memref<36x256xf32, #tpu.memory_space<vmem>>, vector<4x256xf32>,
    %c0_27 = arith.constant 0 : index
    %c0_28 = arith.constant 0 : index
    %c32 = arith.constant 32 : index
    %47 = vector.load %arg1[%c0_27, %c0_28, %c32] : memref<1x4x290xf32, #tpu.memory_space<vmem>>, vector<1x4x256xf32>
    %48 = vector.shape_cast %47 : vector<1x4x256xf32> to vector<4x256xf32>
    %cst_29 = arith.constant 0.000000e+00 : f32
    %49 = vector.broadcast %cst_29 : f32 to vector<4x256xf32>
    %50 = arith.select %18, %48, %49 : vector<4x256xi1>, vector<4x256xf32>
    %c24 = arith.constant 24 : index
    %c0_30 = arith.constant 0 : index
    %51 = vector.load %arg5[%c24, %c0_30] : memref<36x256xf32, #tpu.memory_space<vmem>>, vector<4x256xf32>
    tpu.vector_store %arg5[%c24, %c0_30], %50 {strides = array<i32>} : memref<36x256xf32, #tpu.memory_space<vmem>>, vector<4x256xf32>,
    %c0_31 = arith.constant 0 : index
    %c0_32 = arith.constant 0 : index
    %c33 = arith.constant 33 : index
    %52 = vector.load %arg1[%c0_31, %c0_32, %c33] : memref<1x4x290xf32, #tpu.memory_space<vmem>>, vector<1x4x256xf32>
    %53 = vector.shape_cast %52 : vector<1x4x256xf32> to vector<4x256xf32>
    %c28 = arith.constant 28 : index
    %c0_33 = arith.constant 0 : index
    %54 = vector.load %arg5[%c28, %c0_33] : memref<36x256xf32, #tpu.memory_space<vmem>>, vector<4x256xf32>
    tpu.vector_store %arg5[%c28, %c0_33], %53 {strides = array<i32>} : memref<36x256xf32, #tpu.memory_space<vmem>>, vector<4x256xf32>,
    %c0_34 = arith.constant 0 : index
    %c0_35 = arith.constant 0 : index
    %c34 = arith.constant 34 : index
    %55 = vector.load %arg1[%c0_34, %c0_35, %c34] : memref<1x4x290xf32, #tpu.memory_space<vmem>>, vector<1x4x256xf32>
    %56 = vector.shape_cast %55 : vector<1x4x256xf32> to vector<4x256xf32>
    %cst_36 = arith.constant 0.000000e+00 : f32
    %57 = vector.broadcast %cst_36 : f32 to vector<4x256xf32>
    %58 = arith.select %20, %56, %57 : vector<4x256xi1>, vector<4x256xf32>
    %c32_37 = arith.constant 32 : index
    %c0_38 = arith.constant 0 : index
    %59 = vector.load %arg5[%c32_37, %c0_38] : memref<36x256xf32, #tpu.memory_space<vmem>>, vector<4x256xf32>
    tpu.vector_store %arg5[%c32_37, %c0_38], %58 {strides = array<i32>} : memref<36x256xf32, #tpu.memory_space<vmem>>, vector<4x256xf32>,
    %c0_39 = arith.constant 0 : index
    %c0_40 = arith.constant 0 : index
    %60 = vector.load %arg2[%c0_39, %c0_40] : memref<8x36xf32, #tpu.memory_space<vmem>>, vector<8x36xf32>
    %c0_41 = arith.constant 0 : index
    %c0_42 = arith.constant 0 : index
    %61 = vector.load %arg5[%c0_41, %c0_42] : memref<36x256xf32, #tpu.memory_space<vmem>>, vector<36x256xf32>
    %cst_43 = arith.constant dense<0.000000e+00> : vector<8x256xf32>
    %62 = tpu.matmul %60, %61, %cst_43 {dimension_numbers = #tpu.dot_dimension_numbers<[1], [0], [0], [1], [0, 0, 1, 1], [], []>} : vector<8x36xf32>, vector<36x256xf32>, vector<8x256xf32> -> vector<8x256xf32>
    %c0_44 = arith.constant 0 : index
    %c0_45 = arith.constant 0 : index
    %63 = vector.load %arg3[%c0_44, %c0_45] : memref<8x1xf32, #tpu.memory_space<vmem>>, vector<8x1xf32>
    %64 = vector.broadcast %63 : vector<8x1xf32> to vector<8x256xf32>
    %65 = arith.addf %62, %64 : vector<8x256xf32>
    %66 = arith.negf %65 : vector<8x256xf32>
    %67 = math.exp %66 : vector<8x256xf32>
    %cst_46 = arith.constant 1.000000e+00 : f32
    %68 = vector.broadcast %cst_46 : f32 to vector<8x256xf32>
    %69 = arith.addf %68, %67 : vector<8x256xf32>
    %70 = arith.divf %68, %69 : vector<8x256xf32>
    %c0_47 = arith.constant 0 : index
    %c0_48 = arith.constant 0 : index
    %c0_49 = arith.constant 0 : index
    %71 = vector.load %arg4[%c0_47, %c0_48, %c0_49] : memref<1x8x256xf32, #tpu.memory_space<vmem>>, vector<1x8x256xf32>
    %72 = vector.shape_cast %71 : vector<1x8x256xf32> to vector<8x256xf32>
    %73 = vector.shape_cast %70 : vector<8x256xf32> to vector<1x8x256xf32>
    tpu.vector_store %arg4[%c0_47, %c0_48, %c0_49], %73 {strides = array<i32>} : memref<1x8x256xf32, #tpu.memory_space<vmem>>, vector<1x8x256xf32>,
    return
  }
  func.func @transform_0(%arg0: i32) -> (i32, i32, i32) {
    %c0_i32 = arith.constant 0 : i32
    %c0_i32_0 = arith.constant 0 : i32
    %c0_i32_1 = arith.constant 0 : i32
    return %arg0, %c0_i32, %c0_i32_0 : i32, i32, i32
  }
  func.func @transform_1(%arg0: i32) -> (i32, i32) {
    %c0_i32 = arith.constant 0 : i32
    %c0_i32_0 = arith.constant 0 : i32
    %c0_i32_1 = arith.constant 0 : i32
    return %c0_i32, %c0_i32_0 : i32, i32
  }
  func.func @transform_2(%arg0: i32) -> (i32, i32) {
    %c0_i32 = arith.constant 0 : i32
    %c0_i32_0 = arith.constant 0 : i32
    %c0_i32_1 = arith.constant 0 : i32
    return %c0_i32, %c0_i32_0 : i32, i32
  }
  func.func @transform_3(%arg0: i32) -> (i32, i32, i32) {
    %c0_i32 = arith.constant 0 : i32
    %c0_i32_0 = arith.constant 0 : i32
    %c0_i32_1 = arith.constant 0 : i32
    return %arg0, %c0_i32, %c0_i32_0 : i32, i32, i32
  }
}

</mosaic_0001>

<bundles_post_ra>
// kernel: tpu_custom_call.1
= control target key start
LH: loop header
LB: loop body
LE: loop exit
PB: predicated region body
PF: predicated region fallthrough
CT: control target
= control target key end

     0   :  { %8 = vsyncpa [#allocation4], 0  ;;  %s1056_s0 = inlined_call_operand.hbm [shape: f32[2,4,290], index: 0, kind: input, shape index: {}]   ;;  %s1057_s1 = inlined_call_operand.vmem [shape: f32[8,36], index: 1, kind: input, shape index: {}]   ;;  %s1058_s2 = inlined_call_operand.vmem [shape: f32[8,1], index: 2, kind: input, shape index: {}]   ;;  %s1059_s3 = inlined_call_operand.hbm [shape: f32[2,8,256], index: 3, kind: output, shape index: {}]  }
   0x1   :  { %10 = vsyncpa [#allocation4 + $0x1], 0 }
   0x2   :  { %11 = vsyncpa [#allocation5], 0 }
   0x3   :  { %13 = vsyncpa [#allocation5 + $0x1], 0  ;;  %s846_s12 = smov 0   ;;  %s848_s13 = smov 0  }
   0x4   :  { %s850_s14 = smov 0   ;;  %s852_s15 = smov 0  }
   0x5 LB: > { %s867_s16 = sadd.s32 4294967295, %s815_s15   ;;  %s634_s17 = sadd.s32 4294967294, %s815_s15   ;;  %s815_s15 = sphi %s852_s15, %s1075_s15   ;;  %s811_s14 = sphi %s850_s14, %s1074_s14   ;;  %s807_s13 = sphi %s848_s13, %s1073_s13   ;;  %s803_s12 = sphi %s846_s12, %s1072_s12  }
   0x6   : > { %s871_s18 = sadd.s32 1, %s815_s15   ;;  %s26_s19 = sadd.s32 1, %s811_s14 }
   0x7   : > { %s23_s20 = ssub.s32 %s815_s15, %s871_s18  ;;  %p33_p0 = scmp.ne.s32.totalorder %s811_s14, %s807_s13 }
   0x8   : > { %p24_p1 = scmp.eq.s32.totalorder %s23_s20, 0  ;;  %p34_p2 = scmp.eq.s32.totalorder %s815_s15, 0 }
   0x9   : > { %p39_p3 = scmp.ne.s32.totalorder %s807_s13, %s803_s12  ;;  %p40_p4 = scmp.eq.s32.totalorder %s867_s16, 0 }
   0xa   : > { %s883_s21 = scalar_select %p24_p1, %s811_s14, %s26_s19  }
   0xb   : > { %p35_p5 = por %p34_p2, %p33_p0  ;;  %p885_p6 = por %p40_p4, %p39_p3 }
   0xc   : > { %p105_p7 = scmp.eq.s32.totalorder %s867_s16, 1  ;;  %p111_p8 = scmp.eq.s32.totalorder %s634_s17, 1 }
   0xd   : > { %p636_p9 = scmp.ge.s32.totalorder %s815_s15, 2  ;;  %p667_p10 = scmp.lt.s32.totalorder %s815_s15, 2 }
   0xe   : > { %p892_p11 = por %p105_p7, %p33_p0  ;;  %p896_p12 = por %p111_p8, %p39_p3 }
   0xf   : > { %s137_s25 = sand.u32 1, %s811_s14   ;;  %s653_s26 = smul.u32 12, %s815_s15 }
  0x10   : > { %s652_s27 = smul.u32 12, %s137_s25  ;;  %p905_p13 = pnand %p667_p10, %p35_p5 }
  0x11   : > { %s146_s30 = scalar_lea.hbm %s1056_s0, %s653_s26  ;;  %s138_s8 = scalar_lea.sflag [#allocation4], %s137_s25 }
  0x12   : > { %s148_s5 = sshll.u32 %s146_s30, 4  ;;  %s141_s6 = scalar_lea.vmem [#allocation3], %s652_s27  ;;  %s149_s5 = int_to_ptr.hbm [resolvable:$true] %s148_s5 }
  0x13   : > { %s150_s7 = sshll.u32 %s141_s6, 4  ;;  %s719_s9 = sshra.s32 %s149_s5, 4  ;;  %s151_s7 = int_to_ptr.vmem [resolvable:$true] %s150_s7  ;;  %s720_s9 = int_to_ptr.hbm [resolvable:$true] %s719_s9 }
  0x14   : > { %s721_s10 = scalar_lea.hbm %s720_s9, 12  ;;  %p723_p1 = pneg %p905_p13 }
  0x15   : > { %p722_p0 = scmp.ne.s32.totalorder %s720_s9, %s721_s10  ;;  %s726_s19 = scalar_lea.hbm %s1056_s0, 24 }
  0x16   : > { %p727_p4 = scmp.lt.s32.totalorder %s720_s9, %s1056_s0  ;;  %p728_p5 = scmp.lt.s32.totalorder %s726_s19, %s721_s10 }
  0x17   : > { %p724_p2 = pnand %p723_p1, %p722_p0 }
  0x18   : > { %p729_p7 = por %p728_p5, %p727_p4 }
  0x19   : > { %p725_p3 = pneg %p724_p2 }
  0x1b   : > { %p730_p8 = pnand %p729_p7, %p725_p3 }
  0x1d   : > { %733 = shalt.err (!%p730_p8)
}
  0x1e   : > { %662 = dma.hbm_to_vmem [thread:$0]  (!%p905_p13), %s149_s5, 192, %s151_s7, %s138_s8  }
  0x1f   : > { %p638_p10 = scmp.ge.s32.totalorder %s815_s15, 1  ;;  %p155_p0 = scmp.lt.s32.totalorder %s815_s15, 3 }
  0x21   : > { %p156_p1 = pnand %p638_p10, %p155_p0 }
  0x22   : > { %s922_s25 = sand.u32 (!%p156_p1), 1, %s807_s13  }
  0x23   : > { %159 = sbr.rel (%p156_p1) target bundleno = 422 (0x1a6), region = 32  ;;  %s162_s28 = scalar_lea.sflag (!%p156_p1), [#allocation4], %s922_s25 }
  0x24   : > { %s654_s27 = smul.u32 (!%p156_p1), 12, %s922_s25 }
  0x26   : > { %s926_s29 = scalar_lea.vmem (!%p156_p1), [#allocation3], %s654_s27 }
  0x28   : > { %794 = dma.done.wait (%p885_p6), %s162_s28, 192  }
  0x29   : > { %796 = vsyncadd (%p885_p6), %s162_s28, 4294967104  ;;  %v933_v0 = vld [vmem:[%s926_s29] sm:$0xff]  ;;  %v232_v1 = vld [vmem:[%s926_s29 + $0x8] sm:$0xf]  ;;  %s817_s22 = smov 112   ;;  %s818_s30 = smov 111   ;;  %v189_v35 = vlaneseq }
  0x2a   : > { %222 = vst [vmem:[#allocation1] ss:$2 sm:$0xff] %v933_v0  ;;  %v256_v2 = vld [vmem:[%s926_s29 + $0x8] sm:$0xf]  ;;  %s819_s4 = smov 110   ;;  %s820_s5 = smov 96  }
  0x2b   : > { %238 = vst [vmem:[#allocation1 + $0x11] ss:$2 sm:$0xff] %v232_v1  ;;  %v281_v6 = vld [vmem:[%s926_s29 + $0x8] sm:$0xf]  ;;  %s821_s6 = smov 95   ;;  %s822_s7 = smov 94  }
  0x2c   : > { %v312_v10 = vld [vmem:[%s926_s29 + $0x8] sm:$0xf]  ;;  %s823_s8 = smov 126   ;;  %s824_s9 = smov 127   ;;  %v190_v36 = vand.u32 127, %v189_v35  ;;  %vm350_vm2 = vcmask 900096  }
  0x2d   : > { %v335_v14 = vld [vmem:[%s926_s29 + $0x8] sm:$0xf]  ;;  %vm296_vm4 = vcmask 916480   ;;  %vm327_vm5 = vcmask 908288   ;;  %vm381_vm7 = vcmask 785408   ;;  %vm407_vm8 = vcmask 777216  }
  0x2e   : > { %v366_v18 = vld [vmem:[%s926_s29 + $0x8] sm:$0xf]  ;;  %v191_v37 = vadd.s32 128, %v190_v36  ;;  %v196_v42 = vand.u32 15, %v190_v36  ;;  %vm430_vm9 = vcmask 769024   ;;  %vm271_vm10 = vcmask 1031168  }
  0x2f   : > { %v391_v22 = vld [vmem:[%s926_s29 + $0x8] sm:$0xf]  ;;  %vm248_vm11 = vcmask 1039360   ;;  %vm460_vm12 = vcmask 1043456   ;;  %vm456_vm13 = vcmask 293888   ;;  %s639_s20 = sshll.u32 %s922_s25, 4 }
  0x30   : > { %v415_v26 = vld [vmem:[%s926_s29 + $0x8] sm:$0xf]  ;;  %v203_v38 = vand.u32 15, %v191_v37  ;;  %vm975_vm1 = vcmp.ne.s32.totalorder %v196_v42, 0  ;;  %vm993_vm6 = vcmp.ne.s32.totalorder %v196_v42, 15  ;;  %s651_s26 = sshll.u32 %s867_s16, 4 }
  0x31   : > { %v938_v3 = vld.sshfl [vmem:[#allocation1] sm:$0xff pattern:$0x75316420]  ;;  %v940_v4 = vld.sshfl [vmem:[#allocation1 + $0x8] sm:$0xff pattern:$0x75316420]  ;;  %s559_s29 = scalar_lea.hbm %s1059_s3, %s651_s26 }
  0x32   : > { %236 = vst [vmem:[#allocation1 + $0x1] ss:$2 sm:$0xff] %v933_v0  ;;  %v943_v5 = vld.sshfl [vmem:[#allocation1 + $0x10] sm:$0xff pattern:$0x75316420]  ;;  %vm968_vm0 = vcmp.ne.s32.totalorder %v203_v38, 0 }
  0x33   : > { %261 = vst [vmem:[#allocation1 + $0x10] ss:$2 sm:$0xff] %v256_v2  ;;  %v228_v40 = vsel %vm968_vm0, %v940_v4, 0.0  ;;  %v227_v44 = vsel %vm975_vm1, %v938_v3, 0.0  ;;  %vm982_vm3 = vcmp.ne.s32.totalorder %v203_v38, 15  ;;  %v439_v47 = vld [vmem:[%s1057_s1] sm:$0xff] }
  0x34   : > { %230 = vst [vmem:[#allocation2] sm:$0xf] %v228_v40 }
  0x35   : > { %229 = vst [vmem:[#allocation2 + $0x30] sm:$0xf] %v227_v44 }
  0x39   : > { %v946_v7 = vld.sshfl [vmem:[#allocation1] sm:$0xff pattern:$0x75316420]  ;;  %v948_v8 = vld.sshfl [vmem:[#allocation1 + $0x8] sm:$0xff pattern:$0x75316420] }
  0x3a   : > { %259 = vst [vmem:[#allocation1] ss:$2 sm:$0xff] %v933_v0  ;;  %v264_v9 = vld.sshfl [vmem:[#allocation1 + $0x10] sm:$0xff pattern:$0x75316420] }
  0x3b   : > { %286 = vst [vmem:[#allocation1 + $0x10] ss:$2 sm:$0xff] %v281_v6 }
  0x41   : > { %v952_v11 = vld.sshfl [vmem:[#allocation1] sm:$0xff pattern:$0x75316420]  ;;  %v263_v12 = vld.sshfl [vmem:[#allocation1 + $0x8] sm:$0xff pattern:$0x75316420] }
  0x42   : > { %284 = vst [vmem:[#allocation1] ss:$2 sm:$0xff] %v933_v0  ;;  %v289_v13 = vld.sshfl [vmem:[#allocation1 + $0x10] sm:$0xff pattern:$0x75316420] }
  0x43   : > { %294 = vrot.lane.b32.xlu2 %v289_v13, %s817_s22  ;;  %317 = vst [vmem:[#allocation1 + $0x10] ss:$2 sm:$0xff] %v312_v10 }
  0x49   : > { %v288_v15 = vld.sshfl [vmem:[#allocation1 + $0x8] sm:$0xff pattern:$0x75316420]  ;;  %v287_v16 = vld.sshfl [vmem:[#allocation1] sm:$0xff pattern:$0x75316420] }
  0x4a   : > { %292 = vrot.lane.b32.xlu1 %v288_v15, %s817_s22  ;;  %290 = vrot.lane.b32.xlu0 %v287_v16, %s817_s22  ;;  %315 = vst [vmem:[#allocation1] ss:$2 sm:$0xff] %v933_v0  ;;  %v320_v17 = vld.sshfl [vmem:[#allocation1 + $0x10] sm:$0xff pattern:$0x75316420]  ;;  %s188_s22 = scalar_lea.vmem [#allocation6], %s639_s20 }
  0x4b   : > { %325 = vrot.lane.b32.xlu2 %v320_v17, %s818_s30  ;;  %340 = vst [vmem:[#allocation1 + $0x10] ss:$2 sm:$0xff] %v335_v14  ;;  %s561_s16 = sshll.u32 %s188_s22, 4  ;;  %s562_s16 = int_to_ptr.vmem [resolvable:$true] %s561_s16 }
  0x51   : > { %v319_v19 = vld.sshfl [vmem:[#allocation1 + $0x8] sm:$0xff pattern:$0x75316420]  ;;  %v318_v20 = vld.sshfl [vmem:[#allocation1] sm:$0xff pattern:$0x75316420] }
  0x52   : > { %323 = vrot.lane.b32.xlu1 %v319_v19, %s818_s30  ;;  %321 = vrot.lane.b32.xlu0 %v318_v20, %s818_s30  ;;  %338 = vst [vmem:[#allocation1] ss:$2 sm:$0xff] %v933_v0  ;;  %v343_v21 = vld.sshfl [vmem:[#allocation1 + $0x10] sm:$0xff pattern:$0x75316420]  ;;  %v450_v19 = vld [vmem:[%s1058_s2] sm:$0xff] }
  0x53   : > { %348 = vrot.lane.b32.xlu2 %v343_v21, %s819_s4  ;;  %371 = vst [vmem:[#allocation1 + $0x10] ss:$2 sm:$0xff] %v366_v18  ;;  %v825_v20 = vmov 0   ;;  %s563_s30 = sshll.u32 %s559_s29, 4  ;;  %s564_s30 = int_to_ptr.hbm [resolvable:$true] %s563_s30 }
  0x54   : > { %710 = vset.pattern.permute.xlu0 %v825_v20 }
  0x59   : > { %v341_v23 = vld.sshfl [vmem:[#allocation1] sm:$0xff pattern:$0x75316420]  ;;  %v342_v24 = vld.sshfl [vmem:[#allocation1 + $0x8] sm:$0xff pattern:$0x75316420] }
  0x5a   : > { %344 = vrot.lane.b32.xlu1 %v341_v23, %s819_s4  ;;  %369 = vst [vmem:[#allocation1] ss:$2 sm:$0xff] %v933_v0  ;;  %v374_v25 = vld.sshfl [vmem:[#allocation1 + $0x10] sm:$0xff pattern:$0x75316420] }
  0x5b   : > { %397 = vst [vmem:[#allocation1 + $0x11] ss:$2 sm:$0xff] %v391_v22  ;;  %346 = vrot.lane.b32.xlu2 %v342_v24, %s819_s4  ;;  %s548_s4 = scalar_lea.sflag [#allocation5], %s922_s25 }
  0x61   : > { %v373_v27 = vld.sshfl [vmem:[#allocation1 + $0x8] sm:$0xff pattern:$0x75316420]  ;;  %v372_v28 = vld.sshfl [vmem:[#allocation1] sm:$0xff pattern:$0x75316420] }
  0x62   : > { %377 = vrot.lane.b32.xlu1 %v373_v27, %s820_s5  ;;  %375 = vrot.lane.b32.xlu0 %v372_v28, %s820_s5  ;;  %v400_v29 = vld.sshfl [vmem:[#allocation1 + $0x10] sm:$0xff pattern:$0x75316420]  ;;  %395 = vst [vmem:[#allocation1 + $0x1] ss:$2 sm:$0xff] %v933_v0 }
  0x63   : > { %420 = vst [vmem:[#allocation1 + $0x10] ss:$2 sm:$0xff] %v415_v26  ;;  %379 = vrot.lane.b32.xlu2 %v374_v25, %s820_s5  ;;  %s763_s5 = sshra.s32 %s564_s30, 4  ;;  %s764_s5 = int_to_ptr.hbm [resolvable:$true] %s763_s5 }
  0x64   : > { %p770_p3 = scmp.lt.s32.totalorder %s764_s5, %s1059_s3 }
  0x69   : > { %v398_v30 = vld.sshfl [vmem:[#allocation1] sm:$0xff pattern:$0x75316420]  ;;  %v399_v31 = vld.sshfl [vmem:[#allocation1 + $0x8] sm:$0xff pattern:$0x75316420] }
  0x6a   : > { %v423_v32 = vld.sshfl [vmem:[#allocation1 + $0x10] sm:$0xff pattern:$0x75316420]  ;;  %401 = vrot.lane.b32.xlu0 %v398_v30, %s821_s6  ;;  %418 = vst [vmem:[#allocation1] ss:$2 sm:$0xff] %v933_v0 }
  0x6b   : > { %428 = vrot.lane.b32.xlu1 %v423_v32, %s822_s7  ;;  %405 = vrot.lane.b32.xlu2 %v400_v29, %s821_s6 }
  0x71   : > { %v421_v33 = vld.sshfl [vmem:[#allocation1] sm:$0xff pattern:$0x75316420]  ;;  %v422_v34 = vld.sshfl [vmem:[#allocation1 + $0x8] sm:$0xff pattern:$0x75316420] }
  0x72   : > { %424 = vrot.lane.b32.xlu0 %v421_v33, %s822_s7 }
  0x73   : > { %403 = vrot.lane.b32.xlu1 %v399_v31, %s821_s6  ;;  %269 = vrot.lane.b32.xlu2 %v264_v9, %s823_s8  ;;  %s765_s6 = scalar_lea.hbm %s764_s5, 16 }
  0x74   : > { %p766_p6 = scmp.ne.s32.totalorder %s764_s5, %s765_s6 }
  0x76   : > { %p767_p13 = pnand %p766_p6, %p892_p11 }
  0x78   : > { %p768_p2 = pneg %p767_p13 }
  0x7a   : > { %426 = vrot.lane.b32.xlu0 %v422_v34, %s822_s7 }
  0x7b   : > { %267 = vrot.lane.b32.xlu1 %v263_v12, %s823_s8  ;;  %246 = vrot.lane.b32.xlu2 %v943_v5, %s824_s9 }
  0x82   : > { %265 = vrot.lane.b32.xlu0 %v952_v11, %s823_s8 }
  0x83   : > { %244 = vrot.lane.b32.xlu1 %v948_v8, %s824_s9 }
  0x8a   : > { %242 = vrot.lane.b32.xlu0 %v946_v7, %s824_s9  ;;  %s769_s9 = scalar_lea.hbm %s1059_s3, 32 }
  0x8b   : > { %p771_p4 = scmp.lt.s32.totalorder %s769_s9, %s765_s6 }
  0x8d   : > { %p772_p5 = por %p771_p4, %p770_p3 }
  0x8f   : > { %p773_p7 = pnand %p772_p5, %p768_p2 }
  0x92   : > { %453 = vperm.xlu0 %710, %v450_v19  }
  0x9d   : > { %v295_v41 = vpop.permute.xlu2 %294 }
  0xa5   : > { %v326_v45 = vpop.permute.xlu2 %325 }
  0xad   : > { %v349_v46 = vpop.permute.xlu2 %348 }
  0xb5   : > { %v347_v48 = vpop.permute.xlu2 %346 }
  0xb6   : > { %v352_v49 = vsel %vm350_vm2, %v347_v48, %v349_v46 }
  0xb7   : > { %v356_v50 = vsel %vm982_vm3, %v352_v49, 0.0 }
  0xb8   : > { %v360_v51 = vrot.slane %v356_v50, 4 }
  0xba   : > { %364 = vst [vmem:[#allocation2 + $0x28] sm:$0xf0] %v360_v51 }
  0xbc   : > { %v293_v52 = vpop.permute.xlu1 %292  ;;  %v291_v53 = vpop.permute.xlu0 %290 }
  0xbd   : > { %v298_v54 = vsel %vm296_vm4, %v293_v52, %v295_v41  ;;  %v297_v55 = vsel %vm296_vm4, %v291_v53, %v293_v52  ;;  %v380_v5 = vpop.permute.xlu2 %379 }
  0xbe   : > { %v302_v56 = vsel %vm968_vm0, %v298_v54, 0.0  ;;  %v301_v57 = vsel %vm975_vm1, %v297_v55, 0.0 }
  0xbf   : > { %v306_v58 = vrot.slane %v302_v56, 4  ;;  %v305_v59 = vrot.slane %v301_v57, 4 }
  0xc1   : > { %310 = vst [vmem:[#allocation2 + $0x10] sm:$0xf0] %v306_v58 }
  0xc2   : > { %309 = vst [vmem:[#allocation2 + $0x18] sm:$0xf0] %v305_v59 }
  0xc4   : > { %v324_v60 = vpop.permute.xlu1 %323  ;;  %v322_v61 = vpop.permute.xlu0 %321 }
  0xc5   : > { %v329_v62 = vsel %vm327_vm5, %v324_v60, %v326_v45  ;;  %v328_v63 = vsel %vm327_vm5, %v322_v61, %v324_v60  ;;  %v406_v14 = vpop.permute.xlu2 %405 }
  0xc6   : > { %333 = vst [vmem:[#allocation2 + $0x28] sm:$0xf] %v329_v62 }
  0xc7   : > { %332 = vst [vmem:[#allocation2 + $0x48] sm:$0xf] %v328_v63 }
  0xcc   : > { %v345_v1 = vpop.permute.xlu1 %344 }
  0xcd   : > { %v351_v2 = vsel %vm350_vm2, %v345_v1, %v347_v48  ;;  %v270_v21 = vpop.permute.xlu2 %269  ;;  %v445_v41 = vld [vmem:[#allocation2 + $0x28] sm:$0xff] }
  0xce   : > { %v355_v3 = vsel %vm993_vm6, %v351_v2, 0.0 }
  0xcf   : > { %v359_v4 = vrot.slane %v355_v3, 4 }
  0xd1   : > { %363 = vst [vmem:[#allocation2 + $0x48] sm:$0xf0] %v359_v4 }
  0xd4   : > { %v378_v6 = vpop.permute.xlu1 %377  ;;  %v376_v7 = vpop.permute.xlu0 %375 }
  0xd5   : > { %v382_v8 = vsel %vm381_vm7, %v376_v7, %v378_v6  ;;  %v383_v9 = vsel %vm381_vm7, %v378_v6, %v380_v5  ;;  %v247_v30 = vpop.permute.xlu2 %246 }
  0xd6   : > { %v386_v10 = vsel %vm975_vm1, %v382_v8, 0.0  ;;  %v387_v11 = vsel %vm968_vm0, %v383_v9, 0.0 }
  0xd7   : > { %388 = vst [vmem:[#allocation2 + $0x8] sm:$0xf] %v386_v10 }
  0xd8   : > { %389 = vst [vmem:[#allocation2 + $0x20] sm:$0xf] %v387_v11  ;;  %v444_v40 = vld [vmem:[#allocation2 + $0x48] sm:$0xff] }
  0xdc   : > { %v402_v12 = vpop.permute.xlu0 %401 }
  0xdd   : > { %v429_v13 = vpop.permute.xlu1 %428 }
  0xe4   : > { %v425_v15 = vpop.permute.xlu0 %424 }
  0xe5   : > { %v404_v16 = vpop.permute.xlu1 %403 }
  0xe6   : > { %v408_v17 = vsel %vm407_vm8, %v402_v12, %v404_v16  ;;  %v409_v18 = vsel %vm407_vm8, %v404_v16, %v406_v14 }
  0xe7   : > { %412 = vst [vmem:[#allocation2 + $0x8] sm:$0xf0] %v408_v17 }
  0xe8   : > { %413 = vst [vmem:[#allocation2 + $0x20] sm:$0xf0] %v409_v18 }
  0xec   : > { %v427_v22 = vpop.permute.xlu0 %426 }
  0xed   : > { %v268_v23 = vpop.permute.xlu1 %267  ;;  %v431_v24 = vsel %vm430_vm9, %v425_v15, %v427_v22  ;;  %v432_v25 = vsel %vm430_vm9, %v427_v22, %v429_v13 }
  0xee   : > { %v273_v26 = vsel %vm271_vm10, %v268_v23, %v270_v21  ;;  %v435_v27 = vsel %vm993_vm6, %v431_v24, 0.0  ;;  %v436_v28 = vsel %vm982_vm3, %v432_v25, 0.0  ;;  %v446_v38 = vld [vmem:[#allocation2 + $0x8] sm:$0xff] }
  0xef   : > { %v277_v29 = vsel %vm982_vm3, %v273_v26, 0.0  ;;  %437 = vst [vmem:[#allocation2 + $0x40] sm:$0xf] %v435_v27  ;;  %v447_v39 = vld [vmem:[#allocation2 + $0x20] sm:$0xff] }
  0xf0   : > { %279 = vst [vmem:[#allocation2 + $0x10] sm:$0xf] %v277_v29 }
  0xf1   : > { %438 = vst [vmem:[#allocation2 + $0x38] sm:$0xf] %v436_v28 }
  0xf4   : > { %v266_v31 = vpop.permute.xlu0 %265 }
  0xf5   : > { %v272_v32 = vsel %vm271_vm10, %v266_v31, %v268_v23  ;;  %v245_v33 = vpop.permute.xlu1 %244 }
  0xf6   : > { %v276_v34 = vsel %vm993_vm6, %v272_v32, 0.0  ;;  %v250_v35 = vsel %vm248_vm11, %v245_v33, %v247_v30  ;;  %v448_v36 = vld [vmem:[#allocation2 + $0x40] sm:$0xf] }
  0xf7   : > { %278 = vst [vmem:[#allocation2 + $0x18] sm:$0xf] %v276_v34  ;;  %640 = vmatpush.msk.msra.mxu0 %vm460_vm12, %v448_v36  ;;  %v443_v44 = vld [vmem:[#allocation2 + $0x10] sm:$0xff] }
  0xf8   : > { %254 = vst [vmem:[#allocation2] sm:$0xf0] %v250_v35  ;;  %v449_v37 = vld [vmem:[#allocation2 + $0x38] sm:$0xf] }
  0xf9   : > { %642 = vmatpush.msk.msra.mxu1 %vm460_vm12, %v449_v37  ;;  %479 = vmatpush.msra.mxu0 %v446_v38 }
  0xfb   : > { %499 = vmatpush.msra.mxu1 %v447_v39  ;;  %480 = vmatpush.msra.mxu0 %v444_v40 }
  0xfc   : > { %v243_v42 = vpop.permute.xlu0 %242 }
  0xfd   : > { %500 = vmatpush.msra.mxu1 %v445_v41  ;;  %v249_v43 = vsel %vm248_vm11, %v243_v42, %v245_v33 }
  0xfe   : > { %253 = vst [vmem:[#allocation2 + $0x30] sm:$0xf0] %v249_v43  ;;  %v442_v45 = vld [vmem:[#allocation2 + $0x18] sm:$0xff] }
  0xff   : > { %501 = vmatpush.msra.mxu1 %v443_v44  ;;  %481 = vmatpush.msra.mxu0 %v442_v45  ;;  %v441_v46 = vld [vmem:[#allocation2] sm:$0xff] }
 0x101   : > { %502 = vmatpush.msra.mxu1 %v441_v46 }
 0x102   : > { %643 = vmatmul.msk.f32.vlgmr.msra.gmra.mxu1 %vm456_vm13, %v439_v47 }
 0x104   : > { %v454_v49 = vpop.permute.xlu0 %453 }
 0x105   : > { %v440_v48 = vld [vmem:[#allocation2 + $0x30] sm:$0xff] }
 0x106   : > { %482 = vmatpush.msra.mxu0 %v440_v48 }
 0x107   : > { %641 = vmatmul.msk.f32.vlgmr.msra.gmra.mxu0 %vm456_vm13, %v439_v47 }
 0x17f   : > { %v504_v50 = vpop.f32.mrf.mxu1 }
 0x180   : > { %v505_v51 = vadd.f32 %v504_v50, %v454_v49 }
 0x182   : > { %v645_v52 = vmul.f32 -1.442695, %v505_v51 }
 0x184   : > { %711 = vpow2.f32 %v645_v52  ;;  %v484_v53 = vpop.f32.mrf.mxu0 }
 0x185   : > { %v485_v54 = vadd.f32 %v484_v53, %v454_v49 }
 0x187   : > { %v644_v55 = vmul.f32 -1.442695, %v485_v54 }
 0x189   : > { %713 = vpow2.f32 %v644_v55 }
 0x18a   : > { %v712_v56 = vpop.eup %711 }
 0x18b   : > { %v514_v57 = vadd.f32 1.0, %v712_v56 }
 0x18d   : > { %715 = vrcp.f32 %v514_v57  ;;  %v541_v63 = vand.u32 2147483648, %v514_v57  ;;  %vm535_vm14 = vweird.f32 %v514_v57  ;;  %v539_v2 = vand.u32 2147483647, %v514_v57 }
 0x18f   : > { %v714_v58 = vpop.eup %713  ;;  %v542_v6 = vor.u32 1.1754944e-38, %v541_v63  ;;  %vm540_vm1 = vcmp.eq.f32.partialorder %v539_v2, 8.507059e+37 }
 0x190   : > { %v513_v59 = vadd.f32 1.0, %v714_v58 }
 0x192   : > { %717 = vrcp.f32 %v513_v59  ;;  %v526_v7 = vand.u32 2147483648, %v513_v59  ;;  %v524_v10 = vand.u32 2147483647, %v513_v59  ;;  %vm520_vm3 = vweird.f32 %v513_v59 }
 0x193   : > { %v716_v60 = vpop.eup %715 }
 0x194   : > { %v531_v61 = vmul.f32 %v716_v60, %v514_v57  ;;  %vm536_vm15 = vweird.f32 %v716_v60  ;;  %v527_v13 = vor.u32 1.1754944e-38, %v526_v7  ;;  %vm525_vm5 = vcmp.eq.f32.partialorder %v524_v10, 8.507059e+37 }
 0x195   : > { %vm537_vm0 = vmor %vm535_vm14, %vm536_vm15 }
 0x196   : > { %v532_v62 = vsub.f32 1.0, %v531_v61 }
 0x198   : > { %v718_v0 = vpop.eup %717  ;;  %v533_v1 = vmul.f32 %v716_v60, %v532_v62 }
 0x199   : > { %v516_v3 = vmul.f32 %v718_v0, %v513_v59  ;;  %vm521_vm2 = vweird.f32 %v718_v0 }
 0x19a   : > { %v534_v4 = vadd.f32 %v716_v60, %v533_v1  ;;  %vm522_vm4 = vmor %vm520_vm3, %vm521_vm2 }
 0x19b   : > { %v517_v5 = vsub.f32 1.0, %v516_v3 }
 0x19c   : > { %v538_v8 = vsel %vm537_vm0, %v716_v60, %v534_v4 }
 0x19d   : > { %v518_v9 = vmul.f32 %v718_v0, %v517_v5  ;;  %v543_v11 = vsel %vm540_vm1, %v542_v6, %v538_v8 }
 0x19e   : > { %546 = vst [vmem:[%s188_s22 + $0x8] sm:$0xff] %v543_v11 }
 0x19f   : > { %v519_v12 = vadd.f32 %v718_v0, %v518_v9 }
 0x1a1   : > { %v523_v14 = vsel %vm522_vm4, %v718_v0, %v519_v12 }
 0x1a2   : > { %v528_v15 = vsel %vm525_vm5, %v527_v13, %v523_v14 }
 0x1a3   : > { %545 = vst [vmem:[%s188_s22] sm:$0xff] %v528_v15 }
 0x1a4   : > { %776 = shalt.err (!%p773_p7)
}
 0x1a5   : > { %657 = dma.vmem_to_hbm [thread:$0]  (%p892_p11), %s562_s16, 256, %s564_s30, %s548_s4  }
 0x1a6 PF: > { %s575_s25 = sand.u32 1, %s803_s12   ;;  %p664_p8 = pnand %p636_p9, %p896_p12 }
 0x1a7   : > { %s576_s17 = scalar_lea.sflag [#allocation5], %s575_s25 }
 0x1a8   : > { %p665_p10 = pneg %p664_p8 }
 0x1aa   : > { %798 = dma.done.wait (%p665_p10), %s576_s17, 256  }
 0x1ab   : > { %800 = vsyncadd (%p665_p10), %s576_s17, 4294967040  ;;  %p16_p0 = scmp.ge.s32.totalorder %s871_s18, 4   ;;  %s1072_s12 = smov %s807_s13 }
 0x1ac   : > { %s1073_s13 = smov %s811_s14  ;;  %s1074_s14 = smov %s883_s21 }
 0x1ad   : > { %s1075_s15 = smov %s871_s18  ;;  %18 = sbr.rel (!%p16_p0) target bundleno = 5 (0x5), region = 87 }
 0x1b2   :  { %582 = vsyncpa [#allocation4], 1 }
 0x1b3   :  { %584 = vsyncpa [#allocation4 + $0x1], 1 }
 0x1b4   :  { %585 = vsyncpa [#allocation5], 1 }
 0x1b5   :  { %587 = vsyncpa [#allocation5 + $0x1], 1 }

</bundles_post_ra>
